<compile_context>
chip_gen: v7x
topology: tpu7x:2x2x1
jax: 0.10.0
libtpu: 0.0.40
codegen_flags: <defaults>
</compile_context>

<pallas_src>
import functools

import jax
import jax.numpy as jnp
from jax.experimental import pallas as pl
from jax.experimental.pallas import tpu as pltpu


def _round_up(x: int, m: int) -> int:
    return ((x + m - 1) // m) * m


def _label_smoothing_kernel(pred_ref, tgt_ref, out_ref, *,
                            smoothing: float, classes: int,
                            total_n: int, block_n: int):
    """One grid step: label-smoothed CE partial sum for a block of rows."""
    i = pl.program_id(0)

    x = pred_ref[...].astype(jnp.float32)                       # (bn, C)

    # Numerically stable log-softmax statistics (no full logp materialized).
    m = jnp.max(x, axis=-1, keepdims=True)                      # (bn, 1)
    z = x - m                                                   # (bn, C)
    lse = jnp.log(jnp.sum(jnp.exp(z), axis=-1, keepdims=True))  # (bn, 1)
    sum_z = jnp.sum(z, axis=-1, keepdims=True)                  # (bn, 1)

    t = tgt_ref[...]                                            # (bn, 1) int32
    iota = jax.lax.broadcasted_iota(jnp.int32, z.shape, 1)      # (bn, C)
    z_t = jnp.sum(jnp.where(iota == t, z, 0.0),
                  axis=-1, keepdims=True)                       # (bn, 1)

    sum_logp = sum_z - jnp.float32(classes) * lse               # (bn, 1)
    logp_t = z_t - lse                                          # (bn, 1)

    s = jnp.float32(smoothing / (classes - 1))
    coef_t = jnp.float32((1.0 - smoothing) - smoothing / (classes - 1))
    row_loss = -(s * sum_logp + coef_t * logp_t)                # (bn, 1)

    # Mask rows that belong to the padding of the last tile.
    rows = i * block_n + jax.lax.broadcasted_iota(jnp.int32, row_loss.shape, 0)
    row_loss = jnp.where(rows < total_n, row_loss, 0.0)

    partial = jnp.sum(row_loss)                                 # scalar partial sum
    # Lane-dense unmasked store of this block's partial (wrapper reads [:, 0, 0]).
    out_ref[...] = jnp.full(out_ref.shape, partial, dtype=jnp.float32)


def label_smoothing_loss(pred: jax.Array, target: jax.Array,
                         classes: int, smoothing: float = 0.0,
                         block_n: int | None = None,
                         target_block_bytes: int = 1 << 20) -> jax.Array:
    """pred: (N, C) float logits, target: (N,) int labels -> scalar f32 loss."""
    n, c = pred.shape
    assert classes == c, f"classes ({classes}) must equal pred.shape[1] ({c})"
    assert classes > 1, "label smoothing needs at least 2 classes"

    itemsize = jnp.dtype(pred.dtype).itemsize

    # VMEM-aware tile: ~target_block_bytes of pred per buffer, multiple of 8 rows.
    if block_n is None:
        block_n = max(8, (target_block_bytes // (itemsize * c)) // 8 * 8)
    block_n = _round_up(min(block_n, _round_up(n, 8)), 8)

    n_pad = _round_up(n, block_n)
    num_blocks = n_pad // block_n

    tgt2d = target.astype(jnp.int32).reshape(n, 1)
    if n_pad != n:
        pred = jnp.pad(pred, ((0, n_pad - n), (0, 0)))
        tgt2d = jnp.pad(tgt2d, ((0, n_pad - n), (0, 0)))

    kernel = functools.partial(
        _label_smoothing_kernel,
        smoothing=float(smoothing), classes=int(classes),
        total_n=int(n), block_n=int(block_n),
    )

    # Explicit VMEM budget: double-buffered pred + target blocks + output tile + slack.
    needed = 2 * block_n * c * itemsize + 2 * block_n * 4 + 2 * 8 * 128 * 4
    vmem_limit = min(max(2 * needed + (8 << 20), 16 << 20), 64 << 20)

    partials = pl.pallas_call(
        kernel,
        out_shape=jax.ShapeDtypeStruct((num_blocks, 8, 128), jnp.float32),
        grid_spec=pltpu.PrefetchScalarGridSpec(
            num_scalar_prefetch=0,
            grid=(num_blocks,),
            in_specs=[
                pl.BlockSpec((block_n, c), lambda i: (i, 0)),
                pl.BlockSpec((block_n, 1), lambda i: (i, 0)),
            ],
            out_specs=pl.BlockSpec((1, 8, 128), lambda i: (i, 0, 0)),
        ),
        compiler_params=pltpu.CompilerParams(
            dimension_semantics=("parallel",),
            vmem_limit_bytes=int(vmem_limit)),
    )(pred, tgt2d)

    # Final reduction + mean in the wrapper (keeps the grid axis race-free / parallel).
    return jnp.sum(partials[:, 0, 0]) / jnp.float32(n)


def _reference(pred, target, classes, smoothing):
    logp = jax.nn.log_softmax(pred.astype(jnp.float32), axis=-1)
    true_dist = jnp.full_like(logp, smoothing / (classes - 1))
    true_dist = true_dist.at[jnp.arange(pred.shape[0]), target].set(1.0 - smoothing)
    return jnp.mean(jnp.sum(-true_dist * logp, axis=-1))


if __name__ == "__main__":
    key = jax.random.PRNGKey(0)
    smoothing = 0.1

    # Case 1: tiny CIFAR-style shape (single block).
    N, C = 8, 10
    k1, k2, k3, k4 = jax.random.split(key, 4)
    pred = jax.random.normal(k1, (N, C), dtype=jnp.float32)
    target = jax.random.randint(k2, (N,), 0, C, dtype=jnp.int32)
    loss = jax.block_until_ready(
        label_smoothing_loss(pred, target, classes=C, smoothing=smoothing))
    ref = _reference(pred, target, C, smoothing)
    assert jnp.allclose(loss, ref, atol=1e-5, rtol=1e-5), (loss, ref)

    # Case 2: multi-block grid with a ragged last tile (exercises padding + masking
    # and the "parallel" per-block partial-sum path).
    N2, C2 = 52, 256
    pred2 = jax.random.normal(k3, (N2, C2), dtype=jnp.float32)
    target2 = jax.random.randint(k4, (N2,), 0, C2, dtype=jnp.int32)
    loss2 = jax.block_until_ready(
        label_smoothing_loss(pred2, target2, classes=C2, smoothing=smoothing,
                             block_n=16))
    ref2 = _reference(pred2, target2, C2, smoothing)
    assert jnp.allclose(loss2, ref2, atol=1e-5, rtol=1e-5), (loss2, ref2)

    print("KERNEL_OK")
</pallas_src>

<mosaic_0001>
module attributes {stable_mosaic.version = 11 : i64} {
  func.func @_label_smoothing_kernel(%arg0: i32, %arg1: memref<8x10xf32, #tpu.memory_space<vmem>>, %arg2: memref<8x1xi32, #tpu.memory_space<vmem>>, %arg3: memref<1x8x128xf32, #tpu.memory_space<vmem>>) attributes {dimension_semantics = [#tpu.dimension_semantics<parallel>], iteration_bounds = array<i64: 1>, scalar_prefetch = 0 : i64, scratch_operands = 0 : i64, tpu.core_type = #tpu.core_type<tc>, window_params = [{transform_indices = @transform_0, window_bounds = array<i64: 8, 10>}, {transform_indices = @transform_1, window_bounds = array<i64: 8, 1>}, {transform_indices = @transform_2, window_bounds = array<i64: 1, 8, 128>}]} {
    %c0 = arith.constant 0 : index
    %c0_0 = arith.constant 0 : index
    %0 = vector.load %arg1[%c0, %c0_0] : memref<8x10xf32, #tpu.memory_space<vmem>>, vector<8x10xf32>
    %cst = arith.constant dense<0xFF800000> : vector<8xf32>
    %1 = vector.multi_reduction <maximumf>, %0, %cst [1] : vector<8x10xf32> to vector<8xf32>
    %2 = vector.shape_cast %1 : vector<8xf32> to vector<8x1xf32>
    %3 = vector.broadcast %2 : vector<8x1xf32> to vector<8x10xf32>
    %4 = arith.subf %0, %3 : vector<8x10xf32>
    %5 = math.exp %4 : vector<8x10xf32>
    %cst_1 = arith.constant dense<0.000000e+00> : vector<8xf32>
    %6 = vector.multi_reduction <add>, %5, %cst_1 [1] : vector<8x10xf32> to vector<8xf32>
    %7 = vector.shape_cast %6 : vector<8xf32> to vector<8x1xf32>
    %8 = math.log %7 : vector<8x1xf32>
    %cst_2 = arith.constant dense<0.000000e+00> : vector<8xf32>
    %9 = vector.multi_reduction <add>, %4, %cst_2 [1] : vector<8x10xf32> to vector<8xf32>
    %10 = vector.shape_cast %9 : vector<8xf32> to vector<8x1xf32>
    %c0_3 = arith.constant 0 : index
    %c0_4 = arith.constant 0 : index
    %11 = vector.load %arg2[%c0_3, %c0_4] : memref<8x1xi32, #tpu.memory_space<vmem>>, vector<8x1xi32>
    %12 = tpu.iota {dimensions = array<i32: 1>} : vector<8x10xi32>
    %13 = vector.broadcast %11 : vector<8x1xi32> to vector<8x10xi32>
    %14 = arith.cmpi eq, %12, %13 : vector<8x10xi32>
    %cst_5 = arith.constant 0.000000e+00 : f32
    %15 = vector.broadcast %cst_5 : f32 to vector<8x10xf32>
    %16 = arith.select %14, %4, %15 : vector<8x10xi1>, vector<8x10xf32>
    %cst_6 = arith.constant dense<0.000000e+00> : vector<8xf32>
    %17 = vector.multi_reduction <add>, %16, %cst_6 [1] : vector<8x10xf32> to vector<8xf32>
    %18 = vector.shape_cast %17 : vector<8xf32> to vector<8x1xf32>
    %cst_7 = arith.constant 1.000000e+01 : f32
    %19 = vector.broadcast %cst_7 : f32 to vector<8x1xf32>
    %20 = arith.mulf %19, %8 : vector<8x1xf32>
    %21 = arith.subf %10, %20 : vector<8x1xf32>
    %22 = arith.subf %18, %8 : vector<8x1xf32>
    %cst_8 = arith.constant 0.0111111114 : f32
    %23 = vector.broadcast %cst_8 : f32 to vector<8x1xf32>
    %24 = arith.mulf %23, %21 : vector<8x1xf32>
    %cst_9 = arith.constant 0.888888895 : f32
    %25 = vector.broadcast %cst_9 : f32 to vector<8x1xf32>
    %26 = arith.mulf %25, %22 : vector<8x1xf32>
    %27 = arith.addf %24, %26 : vector<8x1xf32>
    %cst_10 = arith.constant 0.000000e+00 : f32
    %28 = vector.broadcast %cst_10 : f32 to vector<8x1xf32>
    %29 = arith.subf %28, %27 : vector<8x1xf32>
    %c8_i32 = arith.constant 8 : i32
    %30 = arith.muli %arg0, %c8_i32 : i32
    %31 = tpu.iota {dimensions = array<i32: 0>} : vector<8x1xi32>
    %32 = vector.broadcast %30 : i32 to vector<8x1xi32>
    %33 = arith.addi %32, %31 : vector<8x1xi32>
    %c8_i32_11 = arith.constant 8 : i32
    %34 = vector.broadcast %c8_i32_11 : i32 to vector<8x1xi32>
    %35 = arith.cmpi slt, %33, %34 : vector<8x1xi32>
    %cst_12 = arith.constant 0.000000e+00 : f32
    %36 = vector.broadcast %cst_12 : f32 to vector<8x1xf32>
    %37 = arith.select %35, %29, %36 : vector<8x1xi1>, vector<8x1xf32>
    %38 = vector.shape_cast %37 : vector<8x1xf32> to vector<1x8x1xf32>
    %cst_13 = arith.constant dense<0.000000e+00> : vector<1xf32>
    %39 = vector.multi_reduction <add>, %38, %cst_13 [1, 2] : vector<1x8x1xf32> to vector<1xf32>
    %40 = vector.shape_cast %39 : vector<1xf32> to vector<1x1x1xf32>
    %41 = vector.extract %40[0, 0, 0] : f32 from vector<1x1x1xf32>
    %42 = vector.broadcast %41 : f32 to vector<1x8x128xf32>
    %c0_14 = arith.constant 0 : index
    %c0_15 = arith.constant 0 : index
    %c0_16 = arith.constant 0 : index
    %43 = vector.load %arg3[%c0_14, %c0_15, %c0_16] : memref<1x8x128xf32, #tpu.memory_space<vmem>>, vector<1x8x128xf32>
    tpu.vector_store %arg3[%c0_14, %c0_15, %c0_16], %42 {strides = array<i32>} : memref<1x8x128xf32, #tpu.memory_space<vmem>>, vector<1x8x128xf32>,
    return
  }
  func.func @transform_0(%arg0: i32) -> (i32, i32) {
    %c0_i32 = arith.constant 0 : i32
    %c0_i32_0 = arith.constant 0 : i32
    return %arg0, %c0_i32 : i32, i32
  }
  func.func @transform_1(%arg0: i32) -> (i32, i32) {
    %c0_i32 = arith.constant 0 : i32
    %c0_i32_0 = arith.constant 0 : i32
    return %arg0, %c0_i32 : i32, i32
  }
  func.func @transform_2(%arg0: i32) -> (i32, i32, i32) {
    %c0_i32 = arith.constant 0 : i32
    %c0_i32_0 = arith.constant 0 : i32
    %c0_i32_1 = arith.constant 0 : i32
    return %arg0, %c0_i32, %c0_i32_0 : i32, i32, i32
  }
}

</mosaic_0001>

<bundles_post_ra>
// kernel: tpu_custom_call.1
= control target key start
LH: loop header
LB: loop body
LE: loop exit
PB: predicated region body
PF: predicated region fallthrough
CT: control target
= control target key end

     0   :  { %vm13_vm0 = vcmask 80896   ;;  %s152_s0 = inlined_call_operand.vmem [shape: f32[8,10], index: 0, kind: input, shape index: {}]   ;;  %s153_s1 = inlined_call_operand.vmem [shape: s32[8,1], index: 1, kind: input, shape index: {}]   ;;  %s154_s2 = inlined_call_operand.hbm [shape: f32[1,8,128], index: 2, kind: output, shape index: {}]  }
   0x1   :  { %v12_v0 = vld [vmem:[%s152_s0] sm:$0xff] }
   0x2   :  { %7 = vsyncpa [#allocation3], 0  ;;  %v14_v1 = vsel %vm13_vm0, %v12_v0, -inf  ;;  %v113_v2 = vmov 0   ;;  %v28_v3 = vld [vmem:[%s153_s1] sm:$0xff]  ;;  %v29_v7 = vlaneseq  ;;  %vm53_vm2 = vcmask 7168  }
   0x3   :  { %84 = vset.pattern.permute.xlu0 %v113_v2  ;;  %s114_s0 = smov [#allocation2]  }
   0x4   :  { %15 = vmax.xlane.f32.xlu0 %v14_v1  ;;  %v30_v8 = vand.u32 127, %v29_v7  ;;  %s72_s1 = sshll.u32 %s114_s0, 4  ;;  %s73_s1 = int_to_ptr.vmem [resolvable:$true] %s72_s1 }
   0x5   :  { %s89_s14 = scalar_lea.vmem %s73_s1, 128  ;;  %p94_p1 = scmp.lt.s32.totalorder %s73_s1, %s73_s1 }
   0x6   :  { %p90_p0 = scmp.ne.s32.totalorder %s73_s1, %s89_s14  ;;  %p95_p2 = scmp.lt.s32.totalorder %s89_s14, %s89_s14 }
   0x8   :  { %p96_p3 = por %p95_p2, %p94_p1 }
   0xa   :  { %p97_p4 = pnand %p96_p3, %p90_p0 }
  0x1a   :  { %32 = vperm.xlu0 %84, %v28_v3  }
  0x91   :  { %v16_v4 = vpop.xlane.xlu0 %15 }
  0x92   :  { %v17_v5 = vsub.f32 %v12_v0, %v16_v4 }
  0x94   :  { %v18_v6 = vmul.f32 1.442695, %v17_v5  ;;  %v25_v12 = vsel %vm13_vm0, %v17_v5, 0.0 }
  0x96   :  { %85 = vpow2.f32 %v18_v6 }
  0x99   :  { %v33_v10 = vpop.permute.xlu0 %32 }
  0x9a   :  { %vm34_vm1 = vcmp.eq.s32.totalorder %v30_v8, %v33_v10 }
  0x9b   :  { %v35_v13 = vsel %vm34_vm1, %v17_v5, 0.0 }
  0x9c   :  { %v36_v14 = vsel %vm13_vm0, %v35_v13, 0.0 }
  0xa0   :  { %v86_v9 = vpop.eup %85 }
  0xa1   :  { %v20_v11 = vsel %vm13_vm0, %v86_v9, 0.0 }
  0xa2   :  { %21 = vadd.xlane.f32.xlu1 %v20_v11 }
  0xa6   :  { %26 = vadd.xlane.f32.xlu1 %v25_v12 }
  0xaa   :  { %37 = vadd.xlane.f32.xlu1 %v36_v14 }
 0x12f   :  { %v22_v15 = vpop.xlane.xlu1 %21 }
 0x130   :  { %87 = vlog2.f32 %v22_v15 }
 0x133   :  { %v27_v16 = vpop.xlane.xlu1 %26 }
 0x137   :  { %v38_v19 = vpop.xlane.xlu1 %37 }
 0x13a   :  { %v88_v17 = vpop.eup %87 }
 0x13b   :  { %v24_v18 = vmul.f32 0.6931472, %v88_v17 }
 0x13d   :  { %v39_v20 = vmul.f32 10.0, %v24_v18  ;;  %v41_v21 = vsub.f32 %v38_v19, %v24_v18 }
 0x13f   :  { %v40_v22 = vsub.f32 %v27_v16, %v39_v20  ;;  %v43_v24 = vmul.f32 0.8888889, %v41_v21 }
 0x141   :  { %v42_v23 = vmul.f32 0.011111111, %v40_v22 }
 0x143   :  { %v44_v25 = vadd.f32 %v43_v24, %v42_v23 }
 0x145   :  { %v45_v26 = vsub.f32 0.0, %v44_v25 }
 0x147   :  { %v54_v27 = vsel %vm53_vm2, %v45_v26, 0.0 }
 0x148   :  { %55 = vadd.xlane.f32.xlu1 %v54_v27 }
 0x1d5   :  { %v56_v28 = vpop.xlane.xlu1 %55 }
 0x1d6   :  { %v57_v29 = vrot.slane %v56_v28, 4 }
 0x1d8   :  { %v58_v30 = vadd.f32 %v57_v29, %v56_v28 }
 0x1da   :  { %v59_v31 = vrot.slane %v58_v30, 2 }
 0x1dc   :  { %v60_v32 = vadd.f32 %v59_v31, %v58_v30 }
 0x1de   :  { %v61_v33 = vrot.slane %v60_v32, 1 }
 0x1e0   :  { %v62_v34 = vadd.f32 %v61_v33, %v60_v32 }
 0x1e2   :  { %80 = vpush %v62_v34 }
 0x213   :  { %s81_s13 = spop %80 }
 0x214   :  { %v64_v35 = vstv %s81_s13 }
 0x215   :  { %65 = vst [vmem:[#allocation2] sm:$0xff] %v64_v35 }
 0x216   :  { %100 = shalt.err (!%p97_p4)
}
 0x217   :  { %s101_s17 = scalar_lea.hbm %s154_s2, 128 }
 0x218   :  { %p102_p5 = scmp.ne.s32.totalorder %s154_s2, %s101_s17  ;;  %p105_p6 = scmp.lt.u32.totalorder %s101_s17, %s154_s2 }
 0x21a   :  { %p107_p7 = pnand %p105_p6, %p102_p5 }
 0x21c   :  { %110 = shalt.err (!%p107_p7)
}
 0x21d   :  { %75 = dma.vmem_to_hbm [thread:$0]  %s73_s1, 128, %s154_s2, [#allocation3]  }
 0x21e   :  { %111 = dma.done.wait [#allocation3], 128  }
 0x21f   :  { %112 = vsyncadd [#allocation3], 4294967168 }
 0x220   :  { %79 = vsyncpa [#allocation3], 1 }

</bundles_post_ra>
